<compile_context>
chip_gen: v6e
topology: v6e:2x2x1
jax: 0.10.0
libtpu: 0.0.40
codegen_flags: <defaults>
</compile_context>

<pallas_src>
import functools

import jax
import jax.numpy as jnp
from jax.experimental import pallas as pl
from jax.experimental.pallas import tpu as pltpu

INPUT_DIM = 28 * 28            # fixed by the module's forward (x.view(-1, 28*28))
H1, H2, H3 = 256, 128, 64
LANE = 128
SUBLANE = 8


def _round_up(n, m):
    return (n + m - 1) // m * m


def ffn_kernel(x_ref, w1_ref, b1_ref, w2_ref, b2_ref,
               w3_ref, b3_ref, w4_ref, b4_ref, o_ref):
    # x arrives as f32 (single HBM pass); cast to bf16 in-kernel for the MXU.
    x = x_ref[...].astype(jnp.bfloat16)
    # fc1 + ReLU : bf16 operands, f32 accumulation on the MXU
    h = jnp.dot(x, w1_ref[...], preferred_element_type=jnp.float32)
    h = jnp.maximum(h + b1_ref[...], 0.0)
    # fc2 + ReLU
    h = jnp.dot(h.astype(jnp.bfloat16), w2_ref[...],
                preferred_element_type=jnp.float32)
    h = jnp.maximum(h + b2_ref[...], 0.0)
    # fc3 + ReLU (width padded 64 -> 128 with zero weights/bias => padded cols are 0)
    h = jnp.dot(h.astype(jnp.bfloat16), w3_ref[...],
                preferred_element_type=jnp.float32)
    h = jnp.maximum(h + b3_ref[...], 0.0)
    # fc4, no activation (out_dim padded to 128; padded cols sliced off outside)
    h = jnp.dot(h.astype(jnp.bfloat16), w4_ref[...],
                preferred_element_type=jnp.float32)
    o_ref[...] = (h + b4_ref[...]).astype(o_ref.dtype)


def _const_spec(shape):
    # whole-array block, same block every grid step -> stays VMEM-resident
    return pl.BlockSpec(shape, lambda i: (0,) * len(shape))


@functools.partial(jax.jit, static_argnames=("block_b", "out_dtype"))
def ffn_forward(x, params, *, block_b=1024, out_dtype=jnp.float32):
    """x: (..., 28*28)-reshapeable float array; params: dict of (in,out) weights, (1,out) biases."""
    x = x.reshape(-1, INPUT_DIM).astype(jnp.float32)   # mirrors x.view(-1, 28*28)
    B = x.shape[0]
    out_dim = params["w4"].shape[1]

    h3_pad = _round_up(H3, LANE)         # 64  -> 128
    out_pad = _round_up(out_dim, LANE)   # 10  -> 128

    # Weights in bf16, (in, out) layout; pad fc3/fc4 to lane-dense shapes with zeros.
    w1 = params["w1"].astype(jnp.bfloat16)
    w2 = params["w2"].astype(jnp.bfloat16)
    w3 = jnp.pad(params["w3"], ((0, 0), (0, h3_pad - H3))).astype(jnp.bfloat16)
    w4 = jnp.pad(params["w4"],
                 ((0, h3_pad - H3), (0, out_pad - out_dim))).astype(jnp.bfloat16)
    # Biases stay f32 (added onto the f32 accumulator).
    b1 = params["b1"]
    b2 = params["b2"]
    b3 = jnp.pad(params["b3"], ((0, 0), (0, h3_pad - H3)))
    b4 = jnp.pad(params["b4"], ((0, 0), (0, out_pad - out_dim)))

    # Batch tiling: at most block_b rows (multiple of 8 sublanes).  Cap the tile
    # so the grid has >= 2 steps whenever B > 8, so the "parallel" batch axis can
    # actually shard across both TensorCores on v7x.
    tb = min(block_b, _round_up(B, SUBLANE))
    if B > SUBLANE:
        tb = min(tb, _round_up(pl.cdiv(B, 2), SUBLANE))
    b_pad = _round_up(B, tb)
    if b_pad != B:
        x = jnp.pad(x, ((0, b_pad - B), (0, 0)))   # zero tail rows, discarded later

    grid = (b_pad // tb,)

    out_itemsize = jnp.dtype(out_dtype).itemsize
    flops = 2 * b_pad * (INPUT_DIM * H1 + H1 * H2 + H2 * h3_pad + h3_pad * out_pad)
    bytes_accessed = (b_pad * INPUT_DIM * 4                              # f32 x
                      + (w1.size + w2.size + w3.size + w4.size) * 2      # bf16 weights
                      + (b1.size + b2.size + b3.size + b4.size) * 4      # f32 biases
                      + b_pad * out_pad * out_itemsize)                  # output

    # VMEM footprint estimate (double-buffered x/out tiles, resident weights,
    # in-register/VMEM intermediates).  Floor 32 MiB (> every chip's scoped
    # default), ceiling 64 MiB (v7x physical VMEM).
    vmem_est = (2 * tb * INPUT_DIM * 4
                + 2 * tb * out_pad * out_itemsize
                + 2 * ((w1.size + w2.size + w3.size + w4.size) * 2
                       + (b1.size + b2.size + b3.size + b4.size) * 4)
                + tb * (INPUT_DIM * 2 + H1 * 6 + H2 * 6 + h3_pad * 6 + out_pad * 4))
    vmem_limit = int(min(max(32 << 20, int(vmem_est * 1.25)), 64 << 20))

    out = pl.pallas_call(
        ffn_kernel,
        out_shape=jax.ShapeDtypeStruct((b_pad, out_pad), out_dtype),
        grid=grid,
        in_specs=[
            pl.BlockSpec((tb, INPUT_DIM), lambda i: (i, 0)),   # streamed f32 batch tile
            _const_spec(w1.shape), _const_spec(b1.shape),      # VMEM-resident params
            _const_spec(w2.shape), _const_spec(b2.shape),
            _const_spec(w3.shape), _const_spec(b3.shape),
            _const_spec(w4.shape), _const_spec(b4.shape),
        ],
        out_specs=pl.BlockSpec((tb, out_pad), lambda i: (i, 0)),
        compiler_params=pltpu.CompilerParams(
            dimension_semantics=("parallel",),
            vmem_limit_bytes=vmem_limit),
        cost_estimate=pl.CostEstimate(
            flops=flops, transcendentals=0, bytes_accessed=int(bytes_accessed)),
    )(x, w1, b1, w2, b2, w3, b3, w4, b4)

    # Inside jit, this slice fuses with the consumer instead of being a
    # standalone HBM pass over the padded output.
    return out[:B, :out_dim]


def init_params(key, input_dim, output_dim):
    """Deterministic synthetic parameters.

    PyTorch nn.Linear stores weight as (out, in); here we store the transpose
    (in, out) so the kernel computes x @ W directly. Init ~ U(-1/sqrt(in), 1/sqrt(in))
    mimicking nn.Linear's default init.
    """
    dims = [(input_dim, H1), (H1, H2), (H2, H3), (H3, output_dim)]
    params = {}
    for idx, (fan_in, fan_out) in enumerate(dims, start=1):
        key, kw, kb = jax.random.split(key, 3)
        bound = 1.0 / (fan_in ** 0.5)
        params[f"w{idx}"] = jax.random.uniform(
            kw, (fan_in, fan_out), jnp.float32, -bound, bound)
        params[f"b{idx}"] = jax.random.uniform(
            kb, (1, fan_out), jnp.float32, -bound, bound)
    return params


def ffn_reference(x, params):
    """Pure-JAX reference mirroring the kernel's mixed precision (bf16 mul, f32 acc)."""
    x = x.reshape(-1, INPUT_DIM).astype(jnp.float32)

    def mm(a, w):
        return jnp.dot(a.astype(jnp.bfloat16), w.astype(jnp.bfloat16),
                       preferred_element_type=jnp.float32)

    h = jnp.maximum(mm(x, params["w1"]) + params["b1"], 0.0)
    h = jnp.maximum(mm(h, params["w2"]) + params["b2"], 0.0)
    h = jnp.maximum(mm(h, params["w3"]) + params["b3"], 0.0)
    return mm(h, params["w4"]) + params["b4"]


if __name__ == "__main__":
    key = jax.random.PRNGKey(0)
    key, kx, kp = jax.random.split(key, 3)

    batch, output_dim = 8, 10
    params = init_params(kp, INPUT_DIM, output_dim)

    # Input as images; the wrapper applies the module's view(-1, 28*28).
    x = jax.random.normal(kx, (batch, 1, 28, 28), jnp.float32)
    out = jax.block_until_ready(ffn_forward(x, params))
    ref = ffn_reference(x, params)
    assert out.shape == (batch, output_dim)
    assert out.dtype == jnp.float32
    assert jnp.allclose(out, ref, atol=1e-2, rtol=1e-2)

    # bf16 output path (halved writeback for bf16 consumers).
    out_bf16 = jax.block_until_ready(ffn_forward(x, params, out_dtype=jnp.bfloat16))
    assert out_bf16.dtype == jnp.bfloat16
    assert jnp.allclose(out_bf16.astype(jnp.float32), ref, atol=5e-2, rtol=5e-2)

    # Multi-tile / ragged-batch path (B=300: tile capped to 152, grid=2, padded tail).
    key, kx2 = jax.random.split(key)
    x2 = jax.random.normal(kx2, (300, INPUT_DIM), jnp.float32)
    out2 = jax.block_until_ready(ffn_forward(x2, params))
    ref2 = ffn_reference(x2, params)
    assert out2.shape == (300, output_dim)
    assert jnp.allclose(out2, ref2, atol=1e-2, rtol=1e-2)

    print("KERNEL_OK")
</pallas_src>

<mosaic_0001>
module attributes {stable_mosaic.version = 11 : i64} {
  func.func @ffn_kernel(%arg0: i32, %arg1: memref<8x784xf32, #tpu.memory_space<vmem>>, %arg2: memref<784x256xbf16, #tpu.memory_space<vmem>>, %arg3: memref<1x256xf32, #tpu.memory_space<vmem>>, %arg4: memref<256x128xbf16, #tpu.memory_space<vmem>>, %arg5: memref<1x128xf32, #tpu.memory_space<vmem>>, %arg6: memref<128x128xbf16, #tpu.memory_space<vmem>>, %arg7: memref<1x128xf32, #tpu.memory_space<vmem>>, %arg8: memref<128x128xbf16, #tpu.memory_space<vmem>>, %arg9: memref<1x128xf32, #tpu.memory_space<vmem>>, %arg10: memref<8x128xf32, #tpu.memory_space<vmem>>) attributes {dimension_semantics = [#tpu.dimension_semantics<parallel>], iteration_bounds = array<i64: 1>, scalar_prefetch = 0 : i64, scratch_operands = 0 : i64, tpu.core_type = #tpu.core_type<tc>, window_params = [{transform_indices = @transform_0, window_bounds = array<i64: 8, 784>}, {pipeline_mode = #tpu.pipeline_mode<synchronous>, transform_indices = @transform_1, window_bounds = array<i64: 784, 256>}, {pipeline_mode = #tpu.pipeline_mode<synchronous>, transform_indices = @transform_2, window_bounds = array<i64: 1, 256>}, {pipeline_mode = #tpu.pipeline_mode<synchronous>, transform_indices = @transform_3, window_bounds = array<i64: 256, 128>}, {pipeline_mode = #tpu.pipeline_mode<synchronous>, transform_indices = @transform_4, window_bounds = array<i64: 1, 128>}, {pipeline_mode = #tpu.pipeline_mode<synchronous>, transform_indices = @transform_5, window_bounds = array<i64: 128, 128>}, {pipeline_mode = #tpu.pipeline_mode<synchronous>, transform_indices = @transform_6, window_bounds = array<i64: 1, 128>}, {pipeline_mode = #tpu.pipeline_mode<synchronous>, transform_indices = @transform_7, window_bounds = array<i64: 128, 128>}, {pipeline_mode = #tpu.pipeline_mode<synchronous>, transform_indices = @transform_8, window_bounds = array<i64: 1, 128>}, {transform_indices = @transform_9, window_bounds = array<i64: 8, 128>}]} {
    %c0 = arith.constant 0 : index
    %c0_0 = arith.constant 0 : index
    %0 = vector.load %arg1[%c0, %c0_0] : memref<8x784xf32, #tpu.memory_space<vmem>>, vector<8x784xf32>
    %1 = arith.truncf %0 : vector<8x784xf32> to vector<8x784xbf16>
    %c0_1 = arith.constant 0 : index
    %c0_2 = arith.constant 0 : index
    %2 = vector.load %arg2[%c0_1, %c0_2] : memref<784x256xbf16, #tpu.memory_space<vmem>>, vector<784x256xbf16>
    %cst = arith.constant dense<0.000000e+00> : vector<8x256xf32>
    %3 = tpu.matmul %1, %2, %cst {dimension_numbers = #tpu.dot_dimension_numbers<[1], [0], [0], [1], [0, 0, 1, 1], [], []>} : vector<8x784xbf16>, vector<784x256xbf16>, vector<8x256xf32> -> vector<8x256xf32>
    %c0_3 = arith.constant 0 : index
    %c0_4 = arith.constant 0 : index
    %4 = vector.load %arg3[%c0_3, %c0_4] : memref<1x256xf32, #tpu.memory_space<vmem>>, vector<1x256xf32>
    %5 = vector.broadcast %4 : vector<1x256xf32> to vector<8x256xf32>
    %6 = arith.addf %3, %5 : vector<8x256xf32>
    %cst_5 = arith.constant 0.000000e+00 : f32
    %7 = vector.broadcast %cst_5 : f32 to vector<8x256xf32>
    %8 = arith.maximumf %6, %7 : vector<8x256xf32>
    %9 = arith.truncf %8 : vector<8x256xf32> to vector<8x256xbf16>
    %c0_6 = arith.constant 0 : index
    %c0_7 = arith.constant 0 : index
    %10 = vector.load %arg4[%c0_6, %c0_7] : memref<256x128xbf16, #tpu.memory_space<vmem>>, vector<256x128xbf16>
    %cst_8 = arith.constant dense<0.000000e+00> : vector<8x128xf32>
    %11 = tpu.matmul %9, %10, %cst_8 {dimension_numbers = #tpu.dot_dimension_numbers<[1], [0], [0], [1], [0, 0, 1, 1], [], []>} : vector<8x256xbf16>, vector<256x128xbf16>, vector<8x128xf32> -> vector<8x128xf32>
    %c0_9 = arith.constant 0 : index
    %c0_10 = arith.constant 0 : index
    %12 = vector.load %arg5[%c0_9, %c0_10] : memref<1x128xf32, #tpu.memory_space<vmem>>, vector<1x128xf32>
    %13 = vector.broadcast %12 : vector<1x128xf32> to vector<8x128xf32>
    %14 = arith.addf %11, %13 : vector<8x128xf32>
    %cst_11 = arith.constant 0.000000e+00 : f32
    %15 = vector.broadcast %cst_11 : f32 to vector<8x128xf32>
    %16 = arith.maximumf %14, %15 : vector<8x128xf32>
    %17 = arith.truncf %16 : vector<8x128xf32> to vector<8x128xbf16>
    %c0_12 = arith.constant 0 : index
    %c0_13 = arith.constant 0 : index
    %18 = vector.load %arg6[%c0_12, %c0_13] : memref<128x128xbf16, #tpu.memory_space<vmem>>, vector<128x128xbf16>
    %cst_14 = arith.constant dense<0.000000e+00> : vector<8x128xf32>
    %19 = tpu.matmul %17, %18, %cst_14 {dimension_numbers = #tpu.dot_dimension_numbers<[1], [0], [0], [1], [0, 0, 1, 1], [], []>} : vector<8x128xbf16>, vector<128x128xbf16>, vector<8x128xf32> -> vector<8x128xf32>
    %c0_15 = arith.constant 0 : index
    %c0_16 = arith.constant 0 : index
    %20 = vector.load %arg7[%c0_15, %c0_16] : memref<1x128xf32, #tpu.memory_space<vmem>>, vector<1x128xf32>
    %21 = vector.broadcast %20 : vector<1x128xf32> to vector<8x128xf32>
    %22 = arith.addf %19, %21 : vector<8x128xf32>
    %cst_17 = arith.constant 0.000000e+00 : f32
    %23 = vector.broadcast %cst_17 : f32 to vector<8x128xf32>
    %24 = arith.maximumf %22, %23 : vector<8x128xf32>
    %25 = arith.truncf %24 : vector<8x128xf32> to vector<8x128xbf16>
    %c0_18 = arith.constant 0 : index
    %c0_19 = arith.constant 0 : index
    %26 = vector.load %arg8[%c0_18, %c0_19] : memref<128x128xbf16, #tpu.memory_space<vmem>>, vector<128x128xbf16>
    %cst_20 = arith.constant dense<0.000000e+00> : vector<8x128xf32>
    %27 = tpu.matmul %25, %26, %cst_20 {dimension_numbers = #tpu.dot_dimension_numbers<[1], [0], [0], [1], [0, 0, 1, 1], [], []>} : vector<8x128xbf16>, vector<128x128xbf16>, vector<8x128xf32> -> vector<8x128xf32>
    %c0_21 = arith.constant 0 : index
    %c0_22 = arith.constant 0 : index
    %28 = vector.load %arg9[%c0_21, %c0_22] : memref<1x128xf32, #tpu.memory_space<vmem>>, vector<1x128xf32>
    %29 = vector.broadcast %28 : vector<1x128xf32> to vector<8x128xf32>
    %30 = arith.addf %27, %29 : vector<8x128xf32>
    %c0_23 = arith.constant 0 : index
    %c0_24 = arith.constant 0 : index
    %31 = vector.load %arg10[%c0_23, %c0_24] : memref<8x128xf32, #tpu.memory_space<vmem>>, vector<8x128xf32>
    tpu.vector_store %arg10[%c0_23, %c0_24], %30 {strides = array<i32>} : memref<8x128xf32, #tpu.memory_space<vmem>>, vector<8x128xf32>,
    return
  }
  func.func @transform_0(%arg0: i32) -> (i32, i32) {
    %c0_i32 = arith.constant 0 : i32
    %c0_i32_0 = arith.constant 0 : i32
    return %arg0, %c0_i32 : i32, i32
  }
  func.func @transform_1(%arg0: i32) -> (i32, i32) {
    %c0_i32 = arith.constant 0 : i32
    %c0_i32_0 = arith.constant 0 : i32
    %c0_i32_1 = arith.constant 0 : i32
    return %c0_i32, %c0_i32_0 : i32, i32
  }
  func.func @transform_2(%arg0: i32) -> (i32, i32) {
    %c0_i32 = arith.constant 0 : i32
    %c0_i32_0 = arith.constant 0 : i32
    %c0_i32_1 = arith.constant 0 : i32
    return %c0_i32, %c0_i32_0 : i32, i32
  }
  func.func @transform_3(%arg0: i32) -> (i32, i32) {
    %c0_i32 = arith.constant 0 : i32
    %c0_i32_0 = arith.constant 0 : i32
    %c0_i32_1 = arith.constant 0 : i32
    return %c0_i32, %c0_i32_0 : i32, i32
  }
  func.func @transform_4(%arg0: i32) -> (i32, i32) {
    %c0_i32 = arith.constant 0 : i32
    %c0_i32_0 = arith.constant 0 : i32
    %c0_i32_1 = arith.constant 0 : i32
    return %c0_i32, %c0_i32_0 : i32, i32
  }
  func.func @transform_5(%arg0: i32) -> (i32, i32) {
    %c0_i32 = arith.constant 0 : i32
    %c0_i32_0 = arith.constant 0 : i32
    %c0_i32_1 = arith.constant 0 : i32
    return %c0_i32, %c0_i32_0 : i32, i32
  }
  func.func @transform_6(%arg0: i32) -> (i32, i32) {
    %c0_i32 = arith.constant 0 : i32
    %c0_i32_0 = arith.constant 0 : i32
    %c0_i32_1 = arith.constant 0 : i32
    return %c0_i32, %c0_i32_0 : i32, i32
  }
  func.func @transform_7(%arg0: i32) -> (i32, i32) {
    %c0_i32 = arith.constant 0 : i32
    %c0_i32_0 = arith.constant 0 : i32
    %c0_i32_1 = arith.constant 0 : i32
    return %c0_i32, %c0_i32_0 : i32, i32
  }
  func.func @transform_8(%arg0: i32) -> (i32, i32) {
    %c0_i32 = arith.constant 0 : i32
    %c0_i32_0 = arith.constant 0 : i32
    %c0_i32_1 = arith.constant 0 : i32
    return %c0_i32, %c0_i32_0 : i32, i32
  }
  func.func @transform_9(%arg0: i32) -> (i32, i32) {
    %c0_i32 = arith.constant 0 : i32
    %c0_i32_0 = arith.constant 0 : i32
    return %arg0, %c0_i32 : i32, i32
  }
}

</mosaic_0001>

<bundles_post_ra>
// kernel: ffn_forward.1
= control target key start
LH: loop header
LB: loop body
LE: loop exit
PB: predicated region body
PF: predicated region fallthrough
CT: control target
= control target key end

     0   :  { %vm648_vm0 = vcmask 130048   ;;  %s2154_s0 = inlined_call_operand.vmem [shape: f32[8,784], index: 0, kind: input, shape index: {}]   ;;  %s2155_s1 = inlined_call_operand.vmem [shape: bf16[784,256], index: 1, kind: input, shape index: {}]   ;;  %s2156_s2 = inlined_call_operand.vmem [shape: f32[1,256], index: 2, kind: input, shape index: {}]   ;;  %s2157_s3 = inlined_call_operand.vmem [shape: bf16[256,128], index: 3, kind: input, shape index: {}]   ;;  %s2158_s4 = inlined_call_operand.vmem [shape: f32[1,128], index: 4, kind: input, shape index: {}]   ;;  %s2159_s5 = inlined_call_operand.vmem [shape: bf16[128,128], index: 5, kind: input, shape index: {}]   ;;  %s2160_s6 = inlined_call_operand.vmem [shape: f32[1,128], index: 6, kind: input, shape index: {}]   ;;  %s2161_s7 = inlined_call_operand.vmem [shape: bf16[128,128], index: 7, kind: input, shape index: {}]   ;;  %s2162_s8 = inlined_call_operand.vmem [shape: f32[1,128], index: 8, kind: input, shape index: {}]   ;;  %s2163_s9 = inlined_call_operand.hbm [shape: f32[8,128], index: 9, kind: output, shape index: {}]  }
   0x1   :  { %v1454_v0 = vld [vmem:[%s2155_s1 + $0x74] ss:$8 sps:$4 sm:$0xff]   ;;  %v1456_v1 = vld [vmem:[%s2155_s1 + $0x70] ss:$8 sps:$4 sm:$0xff]   ;;  %v1460_v4 = vld [vmem:[%s2155_s1 + $0x64] ss:$8 sps:$4 sm:$0xff]  }
   0x2   :  { %652 = vmatprep.subr.bf16.mxu0 %v1454_v0  ;;  %v1457_v2 = vld [vmem:[%s2155_s1 + $0x174] ss:$8 sps:$4 sm:$0xff]   ;;  %v1459_v3 = vld [vmem:[%s2155_s1 + $0x170] ss:$8 sps:$4 sm:$0xff]   ;;  %v1462_v5 = vld [vmem:[%s2155_s1 + $0x60] ss:$8 sps:$4 sm:$0xff]  }
   0x3   :  { %653 = vmatpush1.bf16.msra.mxu0 %v1456_v1  ;;  %693 = vmatprep.subr.bf16.mxu1 %v1457_v2  ;;  %v1463_v6 = vld [vmem:[%s2155_s1 + $0x164] ss:$8 sps:$4 sm:$0xff]   ;;  %v1465_v7 = vld [vmem:[%s2155_s1 + $0x160] ss:$8 sps:$4 sm:$0xff]   ;;  %v1466_v8 = vld [vmem:[%s2155_s1 + $0x54] ss:$8 sps:$4 sm:$0xff]  }
   0x4   :  { %694 = vmatpush1.bf16.msra.mxu1 %v1459_v3  ;;  %654 = vmatprep.subr.bf16.mxu0 %v1460_v4  ;;  %v1468_v9 = vld [vmem:[%s2155_s1 + $0x50] ss:$8 sps:$4 sm:$0xff]   ;;  %v1469_v10 = vld [vmem:[%s2155_s1 + $0x154] ss:$8 sps:$4 sm:$0xff]   ;;  %v1472_v11 = vld [vmem:[%s2155_s1 + $0x44] ss:$8 sps:$4 sm:$0xff]  }
   0x5   :  { %695 = vmatprep.subr.bf16.mxu1 %v1463_v6  ;;  %v1471_v12 = vld [vmem:[%s2155_s1 + $0x150] ss:$8 sps:$4 sm:$0xff]   ;;  %v1475_v13 = vld [vmem:[%s2155_s1 + $0x144] ss:$8 sps:$4 sm:$0xff]   ;;  %v1474_v14 = vld [vmem:[%s2155_s1 + $0x40] ss:$8 sps:$4 sm:$0xff]  }
   0x6   :  { %v1478_v15 = vld [vmem:[%s2155_s1 + $0x34] ss:$8 sps:$4 sm:$0xff]   ;;  %v1477_v16 = vld [vmem:[%s2155_s1 + $0x140] ss:$8 sps:$4 sm:$0xff]   ;;  %v1480_v18 = vld [vmem:[%s2155_s1 + $0x30] ss:$8 sps:$4 sm:$0xff]  }
   0x7   :  { %655 = vmatpush1.bf16.msra.mxu0 %v1462_v5  ;;  %v1481_v17 = vld [vmem:[%s2155_s1 + $0x134] ss:$8 sps:$4 sm:$0xff]   ;;  %v1484_v19 = vld [vmem:[%s2155_s1 + $0x24] ss:$8 sps:$4 sm:$0xff]   ;;  %v1483_v20 = vld [vmem:[%s2155_s1 + $0x130] ss:$8 sps:$4 sm:$0xff]  }
   0x8   :  { %656 = vmatprep.subr.bf16.mxu0 %v1466_v8  ;;  %696 = vmatpush1.bf16.msra.mxu1 %v1465_v7  ;;  %v1487_v21 = vld [vmem:[%s2155_s1 + $0x124] ss:$8 sps:$4 sm:$0xff]   ;;  %v1486_v22 = vld [vmem:[%s2155_s1 + $0x20] ss:$8 sps:$4 sm:$0xff]   ;;  %v1490_v23 = vld [vmem:[%s2155_s1 + $0x14] ss:$8 sps:$4 sm:$0xff]  }
   0x9   :  { %697 = vmatprep.subr.bf16.mxu1 %v1469_v10  ;;  %v1489_v24 = vld [vmem:[%s2155_s1 + $0x120] ss:$8 sps:$4 sm:$0xff]   ;;  %v1493_v25 = vld [vmem:[%s2155_s1 + $0x114] ss:$8 sps:$4 sm:$0xff]   ;;  %v1492_v26 = vld [vmem:[%s2155_s1 + $0x10] ss:$8 sps:$4 sm:$0xff]  }
   0xa   :  { %v1496_v27 = vld [vmem:[%s2155_s1 + $0x4] ss:$8 sps:$4 sm:$0xff]   ;;  %v1495_v28 = vld [vmem:[%s2155_s1 + $0x110] ss:$8 sps:$4 sm:$0xff]   ;;  %v1498_v30 = vld [vmem:[%s2155_s1] ss:$8 sps:$4 sm:$0xff]  }
   0xb   :  { %657 = vmatpush1.bf16.msra.mxu0 %v1468_v9  ;;  %v1499_v29 = vld [vmem:[%s2155_s1 + $0x104] ss:$8 sps:$4 sm:$0xff]   ;;  %v1502_v31 = vld [vmem:[%s2155_s1 + $0xf4] ss:$8 sps:$4 sm:$0xff]   ;;  %v1501_v32 = vld [vmem:[%s2155_s1 + $0x100] ss:$8 sps:$4 sm:$0xff]  }
   0xc   :  { %658 = vmatprep.subr.bf16.mxu0 %v1472_v11  ;;  %698 = vmatpush1.bf16.msra.mxu1 %v1471_v12  ;;  %v1505_v33 = vld [vmem:[%s2155_s1 + $0x1f4] ss:$8 sps:$4 sm:$0xff]   ;;  %v1504_v34 = vld [vmem:[%s2155_s1 + $0xf0] ss:$8 sps:$4 sm:$0xff]   ;;  %v1508_v35 = vld [vmem:[%s2155_s1 + $0xe4] ss:$8 sps:$4 sm:$0xff]  }
   0xd   :  { %699 = vmatprep.subr.bf16.mxu1 %v1475_v13  ;;  %v1507_v36 = vld [vmem:[%s2155_s1 + $0x1f0] ss:$8 sps:$4 sm:$0xff]   ;;  %v1511_v37 = vld [vmem:[%s2155_s1 + $0x1e4] ss:$8 sps:$4 sm:$0xff]   ;;  %v1510_v38 = vld [vmem:[%s2155_s1 + $0xe0] ss:$8 sps:$4 sm:$0xff]  }
   0xe   :  { %v1514_v39 = vld [vmem:[%s2155_s1 + $0xd4] ss:$8 sps:$4 sm:$0xff]   ;;  %v1513_v40 = vld [vmem:[%s2155_s1 + $0x1e0] ss:$8 sps:$4 sm:$0xff]   ;;  %v1516_v42 = vld [vmem:[%s2155_s1 + $0xd0] ss:$8 sps:$4 sm:$0xff]  }
   0xf   :  { %659 = vmatpush1.bf16.msra.mxu0 %v1474_v14  ;;  %v1517_v41 = vld [vmem:[%s2155_s1 + $0x1d4] ss:$8 sps:$4 sm:$0xff]   ;;  %v1520_v43 = vld [vmem:[%s2155_s1 + $0xc4] ss:$8 sps:$4 sm:$0xff]   ;;  %v1519_v44 = vld [vmem:[%s2155_s1 + $0x1d0] ss:$8 sps:$4 sm:$0xff]  }
  0x10   :  { %660 = vmatprep.subr.bf16.mxu0 %v1478_v15  ;;  %700 = vmatpush1.bf16.msra.mxu1 %v1477_v16  ;;  %v1523_v45 = vld [vmem:[%s2155_s1 + $0x1c4] ss:$8 sps:$4 sm:$0xff]   ;;  %v1522_v47 = vld [vmem:[%s2155_s1 + $0xc0] ss:$8 sps:$4 sm:$0xff]   ;;  %v1526_v49 = vld [vmem:[%s2155_s1 + $0xb4] ss:$8 sps:$4 sm:$0xff]  }
  0x11   :  { %701 = vmatprep.subr.bf16.mxu1 %v1481_v17  ;;  %v35_v46 = vld [vmem:[%s2154_s0 + $0x8] sm:$0xff]  ;;  %v37_v50 = vld [vmem:[%s2154_s0 + $0x18] sm:$0xff]  ;;  %v34_v4 = vld [vmem:[%s2154_s0] sm:$0xff] }
  0x12   :  { %v42_v48 = vpack.c.bf16 %v35_v46, %v35_v46  ;;  %v1525_v51 = vld [vmem:[%s2155_s1 + $0x1c0] ss:$8 sps:$4 sm:$0xff]   ;;  %v44_v52 = vpack.c.bf16 %v37_v50, %v37_v50  ;;  %v1529_v53 = vld [vmem:[%s2155_s1 + $0x1b4] ss:$8 sps:$4 sm:$0xff]   ;;  %v1528_v54 = vld [vmem:[%s2155_s1 + $0xb0] ss:$8 sps:$4 sm:$0xff]   ;;  %v41_v7 = vpack.c.bf16 %v34_v4, %v34_v4 }
  0x13   :  { %661 = vmatpush1.bf16.msra.mxu0 %v1480_v18  ;;  %v1532_v55 = vld [vmem:[%s2155_s1 + $0xa4] ss:$8 sps:$4 sm:$0xff]   ;;  %v1531_v56 = vld [vmem:[%s2155_s1 + $0x1b0] ss:$8 sps:$4 sm:$0xff]   ;;  %v1534_v58 = vld [vmem:[%s2155_s1 + $0xa0] ss:$8 sps:$4 sm:$0xff]  }
  0x14   :  { %662 = vmatprep.subr.bf16.mxu0 %v1484_v19  ;;  %702 = vmatpush1.bf16.msra.mxu1 %v1483_v20  ;;  %v1535_v57 = vld [vmem:[%s2155_s1 + $0x1a4] ss:$8 sps:$4 sm:$0xff]   ;;  %v1538_v59 = vld [vmem:[%s2155_s1 + $0x94] ss:$8 sps:$4 sm:$0xff]   ;;  %v1537_v60 = vld [vmem:[%s2155_s1 + $0x1a0] ss:$8 sps:$4 sm:$0xff]  }
  0x15   :  { %703 = vmatprep.subr.bf16.mxu1 %v1487_v21  ;;  %684 = vmatprep.mubr.bf16.mxu0 %v42_v48  ;;  %v1541_v61 = vld [vmem:[%s2155_s1 + $0x194] ss:$8 sps:$4 sm:$0xff]   ;;  %v1540_v62 = vld [vmem:[%s2155_s1 + $0x90] ss:$8 sps:$4 sm:$0xff]   ;;  %v1544_v63 = vld [vmem:[%s2155_s1 + $0x84] ss:$8 sps:$4 sm:$0xff]  }
  0x16   :  { %725 = vmatprep.mubr.bf16.mxu1 %v44_v52  ;;  %v1543_v0 = vld [vmem:[%s2155_s1 + $0x190] ss:$8 sps:$4 sm:$0xff]   ;;  %v1546_v1 = vld [vmem:[%s2155_s1 + $0x80] ss:$8 sps:$4 sm:$0xff]   ;;  %v1547_v2 = vld [vmem:[%s2155_s1 + $0x184] ss:$8 sps:$4 sm:$0xff]  }
  0x17   :  { %663 = vmatpush1.bf16.msra.mxu0 %v1486_v22  ;;  %v1549_v3 = vld [vmem:[%s2155_s1 + $0x180] ss:$8 sps:$4 sm:$0xff]   ;;  %v1552_v5 = vld [vmem:[%s2155_s1 + $0x274] ss:$8 sps:$4 sm:$0xff]   ;;  %v1550_v8 = vld [vmem:[%s2155_s1 + $0x270] ss:$8 sps:$4 sm:$0xff]  }
  0x18   :  { %664 = vmatprep.subr.bf16.mxu0 %v1490_v23  ;;  %704 = vmatpush1.bf16.msra.mxu1 %v1489_v24  ;;  %v36_v6 = vld [vmem:[%s2154_s0 + $0x10] sm:$0xff]  ;;  %v1555_v9 = vld [vmem:[%s2155_s1 + $0x264] ss:$8 sps:$4 sm:$0xff]   ;;  %v1595_v11 = vld [vmem:[%s2155_s1 + $0x300] ss:$8 sps:$4 sm:$0xff]   ;;  %v1655_v19 = vmov 0  }
  0x19   :  { %705 = vmatprep.subr.bf16.mxu1 %v1493_v25  ;;  %v43_v10 = vpack.c.bf16 %v36_v6, %v36_v6  ;;  %v1597_v12 = vld [vmem:[%s2155_s1 + $0x304] ss:$8 sps:$4 sm:$0xff]   ;;  %v1553_v13 = vld [vmem:[%s2155_s1 + $0x260] ss:$8 sps:$4 sm:$0xff]   ;;  %v1558_v14 = vld [vmem:[%s2155_s1 + $0x254] ss:$8 sps:$4 sm:$0xff]  }
  0x1a   :  { %v40_v15 = vld [vmem:[%s2154_s0 + $0x30] sm:$0xff]  ;;  %v39_v16 = vld [vmem:[%s2154_s0 + $0x28] sm:$0xff] }
  0x1b   :  { %665 = vmatpush1.bf16.msra.mxu0 %v1492_v26  ;;  %v46_v17 = vpack.c.bf16 %v39_v16, %v39_v16  ;;  %v1556_v18 = vld [vmem:[%s2155_s1 + $0x250] ss:$8 sps:$4 sm:$0xff]   ;;  %v1561_v20 = vld [vmem:[%s2155_s1 + $0x244] ss:$8 sps:$4 sm:$0xff]   ;;  %v47_v21 = vpack.c.bf16 %v40_v15, %v40_v15  ;;  %v1559_v22 = vld [vmem:[%s2155_s1 + $0x240] ss:$8 sps:$4 sm:$0xff]  }
  0x1c   :  { %666 = vmatprep.subr.bf16.mxu0 %v1496_v27  ;;  %706 = vmatpush1.bf16.msra.mxu1 %v1495_v28  ;;  %v1564_v23 = vld [vmem:[%s2155_s1 + $0x234] ss:$8 sps:$4 sm:$0xff]   ;;  %v1562_v24 = vld [vmem:[%s2155_s1 + $0x230] ss:$8 sps:$4 sm:$0xff]   ;;  %v1567_v25 = vld [vmem:[%s2155_s1 + $0x224] ss:$8 sps:$4 sm:$0xff]  }
  0x1d   :  { %707 = vmatprep.subr.bf16.mxu1 %v1499_v29  ;;  %v1565_v26 = vld [vmem:[%s2155_s1 + $0x220] ss:$8 sps:$4 sm:$0xff]   ;;  %v1570_v27 = vld [vmem:[%s2155_s1 + $0x214] ss:$8 sps:$4 sm:$0xff]   ;;  %v1568_v28 = vld [vmem:[%s2155_s1 + $0x210] ss:$8 sps:$4 sm:$0xff]  }
  0x1e   :  { %v1573_v29 = vld [vmem:[%s2155_s1 + $0x204] ss:$8 sps:$4 sm:$0xff]  }
  0x1f   :  { %667 = vmatpush1.bf16.msra.mxu0 %v1498_v30 }
  0x20   :  { %668 = vmatprep.subr.bf16.mxu0 %v1502_v31  ;;  %708 = vmatpush1.bf16.msra.mxu1 %v1501_v32 }
  0x21   :  { %709 = vmatprep.subr.bf16.mxu1 %v1505_v33 }
  0x23   :  { %669 = vmatpush2.bf16.msra.mxu0 %v1504_v34 }
  0x24   :  { %670 = vmatprep.subr.bf16.mxu0 %v1508_v35  ;;  %710 = vmatpush2.bf16.msra.mxu1 %v1507_v36 }
  0x25   :  { %711 = vmatprep.subr.bf16.mxu1 %v1511_v37 }
  0x27   :  { %671 = vmatpush2.bf16.msra.mxu0 %v1510_v38 }
  0x28   :  { %672 = vmatprep.subr.bf16.mxu0 %v1514_v39  ;;  %712 = vmatpush2.bf16.msra.mxu1 %v1513_v40 }
  0x29   :  { %713 = vmatprep.subr.bf16.mxu1 %v1517_v41 }
  0x2b   :  { %673 = vmatpush2.bf16.msra.mxu0 %v1516_v42 }
  0x2c   :  { %674 = vmatprep.subr.bf16.mxu0 %v1520_v43  ;;  %714 = vmatpush2.bf16.msra.mxu1 %v1519_v44 }
  0x2d   :  { %715 = vmatprep.subr.bf16.mxu1 %v1523_v45 }
  0x2f   :  { %675 = vmatpush2.bf16.msra.mxu0 %v1522_v47 }
  0x30   :  { %676 = vmatprep.subr.bf16.mxu0 %v1526_v49  ;;  %716 = vmatpush2.bf16.msra.mxu1 %v1525_v51 }
  0x31   :  { %717 = vmatprep.subr.bf16.mxu1 %v1529_v53 }
  0x33   :  { %677 = vmatpush2.bf16.msra.mxu0 %v1528_v54 }
  0x34   :  { %678 = vmatprep.subr.bf16.mxu0 %v1532_v55  ;;  %718 = vmatpush2.bf16.msra.mxu1 %v1531_v56 }
  0x35   :  { %719 = vmatprep.subr.bf16.mxu1 %v1535_v57 }
  0x37   :  { %679 = vmatpush2.bf16.msra.mxu0 %v1534_v58 }
  0x38   :  { %680 = vmatprep.subr.bf16.mxu0 %v1538_v59  ;;  %720 = vmatpush2.bf16.msra.mxu1 %v1537_v60 }
  0x39   :  { %721 = vmatprep.subr.bf16.mxu1 %v1541_v61 }
  0x3b   :  { %681 = vmatpush2.bf16.msra.mxu0 %v1540_v62 }
  0x3c   :  { %682 = vmatprep.subr.bf16.mxu0 %v1544_v63  ;;  %722 = vmatpush2.bf16.msra.mxu1 %v1543_v0 }
  0x3d   :  { %723 = vmatprep.subr.bf16.mxu1 %v1547_v2 }
  0x3f   :  { %683 = vmatpush2.bf16.msra.mxu0 %v1546_v1 }
  0x40   :  { %734 = vmatprep.subr.bf16.mxu0 %v1552_v5  ;;  %724 = vmatpush2.bf16.msra.mxu1 %v1549_v3 }
  0x41   :  { %789 = vmatprep.subr.bf16.mxu1 %v1597_v12 }
  0x42   :  { %685 = vmatmul.mubr.bf16.vlgmr.msra.gmra.mxu0 %v41_v7 }
  0x43   :  { %735 = vmatpush1.bf16.msra.mxu0 %v1550_v8  ;;  %726 = vmatmul.mubr.bf16.vlgmr.msra.gmra.mxu1 %v43_v10 }
  0x44   :  { %736 = vmatprep.subr.bf16.mxu0 %v1555_v9  ;;  %790 = vmatpush1.bf16.msra.mxu1 %v1595_v11 }
  0x45   :  { %807 = vmatprep.mubr.bf16.mxu1 %v1655_v19  ;;  %766 = vmatprep.mubr.bf16.mxu0 %v46_v17 }
  0x47   :  { %737 = vmatpush1.bf16.msra.mxu0 %v1553_v13 }
  0x48   :  { %738 = vmatprep.subr.bf16.mxu0 %v1558_v14 }
  0x4b   :  { %739 = vmatpush1.bf16.msra.mxu0 %v1556_v18  ;;  %1334 = vmatmul.mubr.msk.bf16.vlgmr.msra.gmra.mxu1 %vm648_vm0, %v47_v21 }
  0x4c   :  { %740 = vmatprep.subr.bf16.mxu0 %v1561_v20 }
  0x4f   :  { %741 = vmatpush1.bf16.msra.mxu0 %v1559_v22 }
  0x50   :  { %742 = vmatprep.subr.bf16.mxu0 %v1564_v23 }
  0x53   :  { %743 = vmatpush1.bf16.msra.mxu0 %v1562_v24 }
  0x54   :  { %744 = vmatprep.subr.bf16.mxu0 %v1567_v25 }
  0x57   :  { %745 = vmatpush1.bf16.msra.mxu0 %v1565_v26 }
  0x58   :  { %746 = vmatprep.subr.bf16.mxu0 %v1570_v27 }
  0x59   :  { %14 = vsyncpa [#allocation3], 0  ;;  %v1571_v30 = vld [vmem:[%s2155_s1 + $0x200] ss:$8 sps:$4 sm:$0xff]   ;;  %v1576_v31 = vld [vmem:[%s2155_s1 + $0x2f4] ss:$8 sps:$4 sm:$0xff]   ;;  %v148_v14 = vlaneseq }
  0x5a   :  { %v1574_v32 = vld [vmem:[%s2155_s1 + $0x2f0] ss:$8 sps:$4 sm:$0xff]   ;;  %v1579_v33 = vld [vmem:[%s2155_s1 + $0x2e4] ss:$8 sps:$4 sm:$0xff]   ;;  %v1577_v34 = vld [vmem:[%s2155_s1 + $0x2e0] ss:$8 sps:$4 sm:$0xff]  }
  0x5b   :  { %747 = vmatpush1.bf16.msra.mxu0 %v1568_v28  ;;  %v1582_v35 = vld [vmem:[%s2155_s1 + $0x2d4] ss:$8 sps:$4 sm:$0xff]   ;;  %v1580_v36 = vld [vmem:[%s2155_s1 + $0x2d0] ss:$8 sps:$4 sm:$0xff]   ;;  %v1585_v37 = vld [vmem:[%s2155_s1 + $0x2c4] ss:$8 sps:$4 sm:$0xff]  }
  0x5c   :  { %748 = vmatprep.subr.bf16.mxu0 %v1573_v29  ;;  %v1583_v38 = vld [vmem:[%s2155_s1 + $0x2c0] ss:$8 sps:$4 sm:$0xff]   ;;  %v1588_v39 = vld [vmem:[%s2155_s1 + $0x2b4] ss:$8 sps:$4 sm:$0xff]   ;;  %v1586_v40 = vld [vmem:[%s2155_s1 + $0x2b0] ss:$8 sps:$4 sm:$0xff]  }
  0x5d   :  { %v1591_v41 = vld [vmem:[%s2155_s1 + $0x2a4] ss:$8 sps:$4 sm:$0xff]   ;;  %v1589_v42 = vld [vmem:[%s2155_s1 + $0x2a0] ss:$8 sps:$4 sm:$0xff]   ;;  %v1594_v43 = vld [vmem:[%s2155_s1 + $0x294] ss:$8 sps:$4 sm:$0xff]  }
  0x5e   :  { %v1592_v44 = vld [vmem:[%s2155_s1 + $0x290] ss:$8 sps:$4 sm:$0xff]   ;;  %v1600_v45 = vld [vmem:[%s2155_s1 + $0x284] ss:$8 sps:$4 sm:$0xff]   ;;  %v1598_v46 = vld [vmem:[%s2155_s1 + $0x280] ss:$8 sps:$4 sm:$0xff]  }
  0x5f   :  { %749 = vmatpush1.bf16.msra.mxu0 %v1571_v30  ;;  %v38_v47 = vld [vmem:[%s2154_s0 + $0x20] sm:$0xff]  ;;  %v1601_v49 = vld [vmem:[%s2157_s3 + $0x78] sm:$0xff]   ;;  %v1603_v51 = vld [vmem:[%s2157_s3 + $0x70] sm:$0xff]   ;;  %v1656_v1 = vmov 0.0   ;;  %v149_v15 = vshrl.u32 %v148_v14, 7  ;;  %vm1657_vm1 = vmmov 0  }
  0x60   :  { %750 = vmatprep.subr.bf16.mxu0 %v1576_v31  ;;  %v45_v48 = vpack.c.bf16 %v38_v47, %v38_v47  ;;  %v1602_v50 = vld [vmem:[%s2157_s3 + $0x38] sm:$0xff]   ;;  %1370 = vmatprep.subr.bf16.mxu1 %v1601_v49  ;;  %v1604_v52 = vld [vmem:[%s2157_s3 + $0x30] sm:$0xff]   ;;  %v1605_v53 = vld [vmem:[%s2157_s3 + $0x68] sm:$0xff]   ;;  %s1658_s27 = smov [#allocation2]  }
  0x61   :  { %1371 = vmatpush3.bf16.msra.mxu1 %v1602_v50  ;;  %v1606_v54 = vld [vmem:[%s2157_s3 + $0x28] sm:$0xff]   ;;  %v1607_v55 = vld [vmem:[%s2157_s3 + $0x60] sm:$0xff]   ;;  %v1609_v57 = vld [vmem:[%s2157_s3 + $0x58] sm:$0xff]   ;;  %v150_v16 = vsub.s32 0, %v149_v15  ;;  %v154_v18 = vsub.s32 1, %v149_v15  ;;  %s1228_s28 = sshll.u32 %s1658_s27, 4  ;;  %s1229_s28 = int_to_ptr.vmem [resolvable:$true] %s1228_s28 }
  0x62   :  { %1372 = vmatprep.subr.bf16.mxu1 %v1603_v51  ;;  %v1608_v56 = vld [vmem:[%s2157_s3 + $0x20] sm:$0xff]   ;;  %v1610_v58 = vld [vmem:[%s2157_s3 + $0x18] sm:$0xff]   ;;  %v1611_v59 = vld [vmem:[%s2157_s3 + $0x50] sm:$0xff]   ;;  %p1638_p1 = scmp.lt.s32.totalorder %s1229_s28, %s1229_s28 }
  0x63   :  { %751 = vmatpush2.bf16.msra.mxu0 %v1574_v32  ;;  %v1612_v60 = vld [vmem:[%s2157_s3 + $0x10] sm:$0xff]   ;;  %v1613_v61 = vld [vmem:[%s2157_s3 + $0x48] sm:$0xff]   ;;  %v1615_v63 = vld [vmem:[%s2157_s3 + $0x40] sm:$0xff]  }
  0x64   :  { %752 = vmatprep.subr.bf16.mxu0 %v1579_v33  ;;  %v1614_v62 = vld [vmem:[%s2157_s3 + $0x8] sm:$0xff]   ;;  %v1616_v0 = vld [vmem:[%s2157_s3] sm:$0xff]   ;;  %v1629_v49 = vld [vmem:[%s2161_s7 + $0x18] sm:$0xff]  }
  0x65   :  { %1373 = vmatpush3.bf16.msra.mxu1 %v1604_v52  ;;  %v146_v17 = vld [vmem:[%s2156_s2] sm:$0x3]  ;;  %v1627_v47 = vld [vmem:[%s2161_s7 + $0x28] sm:$0xff]   ;;  %v1630_v50 = vld [vmem:[%s2161_s7 + $0x10] sm:$0xff]  }
  0x66   :  { %1374 = vmatprep.subr.bf16.mxu1 %v1605_v53  ;;  %v151_v19 = vrot.slane %v146_v17, %v150_v16  ;;  %v155_v20 = vrot.slane %v146_v17, %v154_v18  ;;  %v1335_v52 = vld [vmem:[%s2158_s4] ss:$0 sm:$0xff] }
  0x67   :  { %753 = vmatpush2.bf16.msra.mxu0 %v1577_v34 }
  0x68   :  { %754 = vmatprep.subr.bf16.mxu0 %v1582_v35 }
  0x69   :  { %1375 = vmatpush3.bf16.msra.mxu1 %v1606_v54 }
  0x6a   :  { %1376 = vmatprep.subr.bf16.mxu1 %v1607_v55 }
  0x6b   :  { %755 = vmatpush2.bf16.msra.mxu0 %v1580_v36  ;;  %v1617_v36 = vld [vmem:[%s2159_s5 + $0x38] sm:$0xff]  }
  0x6c   :  { %756 = vmatprep.subr.bf16.mxu0 %v1585_v37 }
  0x6d   :  { %1377 = vmatpush3.bf16.msra.mxu1 %v1608_v56 }
  0x6e   :  { %1378 = vmatprep.subr.bf16.mxu1 %v1609_v57 }
  0x6f   :  { %757 = vmatpush2.bf16.msra.mxu0 %v1583_v38  ;;  %v1618_v38 = vld [vmem:[%s2159_s5 + $0x30] sm:$0xff]  }
  0x70   :  { %758 = vmatprep.subr.bf16.mxu0 %v1588_v39  ;;  %v1619_v39 = vld [vmem:[%s2159_s5 + $0x28] sm:$0xff]  }
  0x71   :  { %1379 = vmatpush3.bf16.msra.mxu1 %v1610_v58 }
  0x72   :  { %1380 = vmatprep.subr.bf16.mxu1 %v1611_v59 }
  0x73   :  { %759 = vmatpush2.bf16.msra.mxu0 %v1586_v40  ;;  %v1620_v40 = vld [vmem:[%s2159_s5 + $0x20] sm:$0xff]  }
  0x74   :  { %760 = vmatprep.subr.bf16.mxu0 %v1591_v41  ;;  %v1621_v41 = vld [vmem:[%s2159_s5 + $0x18] sm:$0xff]  }
  0x75   :  { %1381 = vmatpush3.bf16.msra.mxu1 %v1612_v60  ;;  %v1631_v60 = vld [vmem:[%s2161_s7 + $0x8] sm:$0xff]  }
  0x76   :  { %1382 = vmatprep.subr.bf16.mxu1 %v1613_v61  ;;  %v1632_v61 = vld [vmem:[%s2161_s7] sm:$0xff]  }
  0x77   :  { %761 = vmatpush2.bf16.msra.mxu0 %v1589_v42  ;;  %v1622_v42 = vld [vmem:[%s2159_s5 + $0x10] sm:$0xff]  }
  0x78   :  { %762 = vmatprep.subr.bf16.mxu0 %v1594_v43  ;;  %v1623_v43 = vld [vmem:[%s2159_s5 + $0x8] sm:$0xff]  }
  0x79   :  { %1383 = vmatpush3.bf16.msra.mxu1 %v1614_v62  ;;  %v1352_v62 = vld [vmem:[%s2160_s6] ss:$0 sm:$0xff]  ;;  %s1633_s6 = scalar_lea.vmem %s1229_s28, 128 }
  0x7a   :  { %1384 = vmatprep.subr.bf16.mxu1 %v1615_v63  ;;  %p1634_p0 = scmp.ne.s32.totalorder %s1229_s28, %s1633_s6  ;;  %p1639_p2 = scmp.lt.s32.totalorder %s1633_s6, %s1633_s6 }
  0x7b   :  { %763 = vmatpush2.bf16.msra.mxu0 %v1592_v44  ;;  %v1624_v44 = vld [vmem:[%s2159_s5] sm:$0xff]  }
  0x7c   :  { %764 = vmatprep.subr.bf16.mxu0 %v1600_v45  ;;  %v1625_v45 = vld [vmem:[%s2161_s7 + $0x38] sm:$0xff]   ;;  %p1640_p3 = por %p1639_p2, %p1638_p1 }
  0x7d   :  { %1385 = vmatpush3.bf16.msra.mxu1 %v1616_v0 }
  0x7e   :  { %1410 = vmatprep.subr.bf16.mxu1 %v1656_v1  ;;  %p1641_p4 = pnand %p1640_p3, %p1634_p0 }
  0x7f   :  { %765 = vmatpush2.bf16.msra.mxu0 %v1598_v46  ;;  %v1626_v46 = vld [vmem:[%s2161_s7 + $0x30] sm:$0xff]  }
  0x80   :  { %1430 = vmatprep.subr.bf16.mxu0 %v1656_v1 }
  0x82   :  { %767 = vmatmul.mubr.bf16.vlgmr.msra.gmra.mxu0 %v45_v48  ;;  %v1628_v48 = vld [vmem:[%s2161_s7 + $0x20] sm:$0xff]  }
  0x83   :  { %1446 = vmatprep.mubr.msk.bf16.mxu0 %vm1657_vm1, %v1656_v1  ;;  %1431 = vmatpush3.bf16.msra.mxu0 %v1625_v45 }
  0x84   :  { %1432 = vmatprep.subr.bf16.mxu0 %v1656_v1 }
  0x87   :  { %1433 = vmatpush3.bf16.msra.mxu0 %v1626_v46 }
  0x88   :  { %1434 = vmatprep.subr.bf16.mxu0 %v1656_v1 }
  0x8b   :  { %1435 = vmatpush3.bf16.msra.mxu0 %v1627_v47 }
  0x8c   :  { %1436 = vmatprep.subr.bf16.mxu0 %v1656_v1 }
  0x8f   :  { %1437 = vmatpush3.bf16.msra.mxu0 %v1628_v48 }
  0x90   :  { %1438 = vmatprep.subr.bf16.mxu0 %v1656_v1 }
  0x93   :  { %1439 = vmatpush3.bf16.msra.mxu0 %v1629_v49 }
  0x94   :  { %1440 = vmatprep.subr.bf16.mxu0 %v1656_v1 }
  0x97   :  { %1441 = vmatpush3.bf16.msra.mxu0 %v1630_v50 }
  0x98   :  { %1442 = vmatprep.subr.bf16.mxu0 %v1656_v1 }
  0x9b   :  { %1443 = vmatpush3.bf16.msra.mxu0 %v1631_v60 }
  0x9c   :  { %1444 = vmatprep.subr.bf16.mxu0 %v1656_v1 }
  0x9f   :  { %1445 = vmatpush3.bf16.msra.mxu0 %v1632_v61 }
 0x102   :  { %v686_v2 = vpop.f32.mrf.mxu0 }
 0x103   :  { %v727_v4 = vpop.f32.mrf.mxu1  ;;  %v687_v21 = vadd.f32 %v686_v2, %v151_v19 }
 0x104   :  { %v688_v3 = vpop.f32.mrf.mxu0 }
 0x105   :  { %v729_v6 = vpop.f32.mrf.mxu1  ;;  %v689_v22 = vadd.f32 %v688_v3, %v155_v20  ;;  %v728_v23 = vadd.f32 %v727_v4, %v687_v21 }
 0x106   :  { %v690_v5 = vpop.f32.mrf.mxu0 }
 0x107   :  { %v731_v8 = vpop.f32.mrf.mxu1  ;;  %v730_v25 = vadd.f32 %v729_v6, %v689_v22 }
 0x108   :  { %v691_v7 = vpop.f32.mrf.mxu0 }
 0x109   :  { %v732_v9 = vpop.f32.mrf.mxu1 }
 0x10b   :  { %v809_v10 = vpop.f32.mrf.mxu1 }
 0x10d   :  { %v811_v11 = vpop.f32.mrf.mxu1 }
 0x10f   :  { %v813_v12 = vpop.f32.mrf.mxu1 }
 0x111   :  { %v814_v13 = vpop.f32.mrf.mxu1 }
 0x142   :  { %v768_v24 = vpop.f32.mrf.mxu0 }
 0x143   :  { %v769_v26 = vadd.f32 %v768_v24, %v728_v23 }
 0x144   :  { %v770_v27 = vpop.f32.mrf.mxu0 }
 0x145   :  { %v810_v28 = vadd.f32 %v809_v10, %v769_v26  ;;  %v771_v29 = vadd.f32 %v770_v27, %v730_v25 }
 0x146   :  { %v772_v30 = vpop.f32.mrf.mxu0 }
 0x147   :  { %v812_v31 = vadd.f32 %v811_v11, %v771_v29  ;;  %v816_v32 = vmax.f32 %v810_v28, 0.0 }
 0x148   :  { %v773_v33 = vpop.f32.mrf.mxu0 }
 0x149   :  { %v817_v34 = vmax.f32 %v812_v31, 0.0  ;;  %v818_v37 = vpack.c.bf16 %v816_v32, %v816_v32 }
 0x14b   :  { %v819_v35 = vpack.c.bf16 %v817_v34, %v817_v34 }
 0x14d   :  { %987 = vmatprep.mubr.bf16.mxu1 %v819_v35 }
 0x14e   :  { %988 = vmatmul.mubr.bf16.vlgmr.msra.gmra.mxu1 %v818_v37 }
 0x14f   :  { %1411 = vmatpush3.bf16.msra.mxu1 %v1617_v36  ;;  %1426 = vmatprep.mubr.msk.bf16.mxu1 %vm1657_vm1, %v1656_v1 }
 0x150   :  { %1412 = vmatprep.subr.bf16.mxu1 %v1656_v1 }
 0x153   :  { %1413 = vmatpush3.bf16.msra.mxu1 %v1618_v38 }
 0x154   :  { %1414 = vmatprep.subr.bf16.mxu1 %v1656_v1 }
 0x157   :  { %1415 = vmatpush3.bf16.msra.mxu1 %v1619_v39 }
 0x158   :  { %1416 = vmatprep.subr.bf16.mxu1 %v1656_v1 }
 0x15b   :  { %1417 = vmatpush3.bf16.msra.mxu1 %v1620_v40 }
 0x15c   :  { %1418 = vmatprep.subr.bf16.mxu1 %v1656_v1 }
 0x15f   :  { %1419 = vmatpush3.bf16.msra.mxu1 %v1621_v41 }
 0x160   :  { %1420 = vmatprep.subr.bf16.mxu1 %v1656_v1 }
 0x163   :  { %1421 = vmatpush3.bf16.msra.mxu1 %v1622_v42 }
 0x164   :  { %1422 = vmatprep.subr.bf16.mxu1 %v1656_v1 }
 0x167   :  { %1423 = vmatpush3.bf16.msra.mxu1 %v1623_v43 }
 0x168   :  { %1424 = vmatprep.subr.bf16.mxu1 %v1656_v1  ;;  %v1361_v1 = vld [vmem:[%s2162_s8] ss:$0 sm:$0xff] }
 0x16b   :  { %1425 = vmatpush3.bf16.msra.mxu1 %v1624_v44 }
 0x20e   :  { %v1386_v51 = vpop.f32.mrf.mxu1 }
 0x210   :  { %v1387_v53 = vpop.f32.mrf.mxu1 }
 0x211   :  { %v1388_v54 = vadd.f32 %v1387_v53, %v1386_v51 }
 0x212   :  { %v1389_v55 = vpop.f32.mrf.mxu1 }
 0x213   :  { %v990_v56 = vadd.f32 %v1388_v54, %v1335_v52 }
 0x214   :  { %v1390_v57 = vpop.f32.mrf.mxu1 }
 0x215   :  { %v995_v58 = vmax.f32 %v990_v56, 0.0 }
 0x217   :  { %v996_v59 = vpack.c.bf16 %v995_v58, %v995_v58 }
 0x219   :  { %1427 = vmatmul.mubr.bf16.vlgmr.msra.gmra.mxu1 %v996_v59 }
 0x2d9   :  { %v1102_v63 = vpop.f32.mrf.mxu1 }
 0x2da   :  { %v1103_v0 = vadd.f32 %v1352_v62, %v1102_v63 }
 0x2db   :  { %v1428_v2 = vpop.f32.mrf.mxu1 }
 0x2dc   :  { %v1108_v3 = vmax.f32 %v1103_v0, 0.0 }
 0x2dd   :  { %v1105_v4 = vpop.f32.mrf.mxu1 }
 0x2de   :  { %v1109_v5 = vpack.c.bf16 %v1108_v3, %v1108_v3 }
 0x2df   :  { %v1429_v6 = vpop.f32.mrf.mxu1 }
 0x2e0   :  { %1447 = vmatmul.mubr.bf16.vlgmr.msra.gmra.mxu0 %v1109_v5 }
 0x3a0   :  { %v1215_v7 = vpop.f32.mrf.mxu0 }
 0x3a1   :  { %v1216_v8 = vadd.f32 %v1361_v1, %v1215_v7 }
 0x3a2   :  { %v1448_v9 = vpop.f32.mrf.mxu0 }
 0x3a3   :  { %1221 = vst [vmem:[#allocation2] sm:$0xff] %v1216_v8 }
 0x3a4   :  { %v1218_v10 = vpop.f32.mrf.mxu0 }
 0x3a5   :  { %1644 = shalt.err (!%p1641_p4)
}
 0x3a6   :  { %1231 = dma.vmem_to_hbm [thread:$0]  %s1229_s28, 128, %s2163_s9, [#allocation3]   ;;  %v1449_v11 = vpop.f32.mrf.mxu0 }
 0x3a7   :  { %1653 = dma.done.wait [#allocation3], 128  }
 0x3a8   :  { %1654 = vsyncadd [#allocation3], 4294967168 }
 0x3a9   :  { %1235 = vsyncpa [#allocation3], 1 }

</bundles_post_ra>
